<compile_context>
chip_gen: v6e
topology: v6e:2x2x1
jax: 0.10.0
libtpu: 0.0.40
codegen_flags: <defaults>
</compile_context>

<pallas_src>
import jax
import jax.numpy as jnp
from jax.experimental import pallas as pl
from jax.experimental.pallas import tpu as pltpu


def _motion_feature_kernel(xs_ref, xs1_ref, w_ref, b_ref, out_ref):
    # xs_ref / xs1_ref : [R, HW]   R = samples_per_block * C rows, HW on lanes
    # w_ref            : [R, 2R]   fused block-diagonal weight [kron(I,W1) | kron(I,W2)]
    # b_ref            : [R, 1]    bias tiled per packed sample
    x = jnp.concatenate([xs_ref[...], xs1_ref[...]], axis=0)            # [2R, HW] VMEM sublane concat
    acc = jnp.dot(w_ref[...], x, preferred_element_type=jnp.float32)    # single MXU dot
    acc = acc + b_ref[...]                                              # lane-broadcast bias (once per block)
    out_ref[...] = jnp.maximum(acc, 0.0).astype(out_ref.dtype)


def _rows_per_block(total_rows, c, max_rows=256):
    """Rows (= whole samples * C) per grid block.

    Must divide total_rows, cover whole samples, and either equal total_rows or be a
    multiple of 8 (sublane alignment / (8,128) BlockSpec rule).  Prefer >= 2 grid
    steps so v7x megacore can shard the memory-bound streaming across both
    TensorCores; cap R so the replicated block-diagonal weight stays tiny in VMEM.
    """
    cands = [r for r in range(c, total_rows + 1, c) if total_rows % r == 0]
    ok = [r for r in cands if r == total_rows or (r % 8 == 0 and r <= max_rows)]
    if not ok:
        return total_rows
    multi = [r for r in ok if total_rows // r >= 2]
    return max(multi) if multi else max(ok)


def motion_feature(f_s, f_s_1, weight, bias):
    """f_s, f_s_1: [B,T,C,H,W]; weight: [C,2C,1,1]; bias: [C]  ->  [B,T,C,H,W]."""
    B, T, C, H, W = f_s.shape
    HW = H * W
    total_rows = B * T * C

    # Free reshapes (NCHW is contiguous): rows = (sample, channel), lanes = pixels.
    xs = f_s.reshape(total_rows, HW)
    xs1 = f_s_1.reshape(total_rows, HW)

    R = _rows_per_block(total_rows, C)        # rows per grid block (demo: 16 -> grid=(2,))
    nb = R // C                               # samples packed per block
    grid = (total_rows // R,)

    # Fold torch.cat into the weight: in-channels [0,C) <- f_s, [C,2C) <- f_s_1,
    # then replicate block-diagonally so one dot handles nb samples at once.
    w = weight.reshape(C, 2 * C).astype(jnp.float32)
    eye = jnp.eye(nb, dtype=jnp.float32)
    w1_bd = jnp.kron(eye, w[:, :C])                       # [R, R]
    w2_bd = jnp.kron(eye, w[:, C:])                       # [R, R]
    w_big = jnp.concatenate([w1_bd, w2_bd], axis=1)       # [R, 2R]
    b_tiled = jnp.tile(bias.astype(jnp.float32), nb).reshape(R, 1)

    out = pl.pallas_call(
        _motion_feature_kernel,
        out_shape=jax.ShapeDtypeStruct((total_rows, HW), f_s.dtype),
        grid=grid,
        in_specs=[
            pl.BlockSpec((R, HW), lambda g: (g, 0)),
            pl.BlockSpec((R, HW), lambda g: (g, 0)),
            pl.BlockSpec((R, 2 * R), lambda g: (0, 0)),   # weight resident across grid
            pl.BlockSpec((R, 1), lambda g: (0, 0)),       # bias resident across grid
        ],
        out_specs=pl.BlockSpec((R, HW), lambda g: (g, 0)),
        compiler_params=pltpu.CompilerParams(dimension_semantics=("parallel",)),
    )(xs, xs1, w_big, b_tiled)

    return out.reshape(B, T, C, H, W)


# ----------------------- pure-JAX reference (for check) ----------------------
def _reference(f_s, f_s_1, weight, bias):
    B, T, C, H, W = f_s.shape
    cat = jnp.concatenate([f_s, f_s_1], axis=2)            # [B, T, 2C, H, W]
    x = cat.reshape(B * T, 2 * C, H, W)
    w = weight.reshape(C, 2 * C)
    y = jnp.einsum('oi,nihw->nohw', w, x) + bias[None, :, None, None]
    y = jax.nn.relu(y)
    return y.reshape(B, T, C, H, W)


if __name__ == "__main__":
    # input_size = C = 4 ; inputs are 5-D [B, T, C, H, W] as implied by forward()
    B, T, C, H, W = 2, 4, 4, 16, 16

    key = jax.random.PRNGKey(0)
    k1, k2, k3, k4 = jax.random.split(key, 4)
    f_s = jax.random.normal(k1, (B, T, C, H, W), jnp.float32)
    f_s_1 = jax.random.normal(k2, (B, T, C, H, W), jnp.float32)
    weight = 0.1 * jax.random.normal(k3, (C, 2 * C, 1, 1), jnp.float32)  # Conv2d weight
    bias = 0.05 * jax.random.normal(k4, (C,), jnp.float32)               # Conv2d bias

    out = jax.block_until_ready(motion_feature(f_s, f_s_1, weight, bias))

    ref = _reference(f_s, f_s_1, weight, bias)
    assert out.shape == (B, T, C, H, W)
    assert out.dtype == f_s.dtype
    assert jnp.allclose(out, ref, atol=1e-5, rtol=1e-5), "mismatch vs reference"

    print("KERNEL_OK")
</pallas_src>

<mosaic_0001>
module attributes {stable_mosaic.version = 11 : i64} {
  func.func @_motion_feature_kernel(%arg0: i32, %arg1: memref<16x256xf32, #tpu.memory_space<vmem>>, %arg2: memref<16x256xf32, #tpu.memory_space<vmem>>, %arg3: memref<16x32xf32, #tpu.memory_space<vmem>>, %arg4: memref<16x1xf32, #tpu.memory_space<vmem>>, %arg5: memref<16x256xf32, #tpu.memory_space<vmem>>) attributes {dimension_semantics = [#tpu.dimension_semantics<parallel>], iteration_bounds = array<i64: 2>, scalar_prefetch = 0 : i64, scratch_operands = 0 : i64, tpu.core_type = #tpu.core_type<tc>, window_params = [{transform_indices = @transform_0, window_bounds = array<i64: 16, 256>}, {transform_indices = @transform_1, window_bounds = array<i64: 16, 256>}, {pipeline_mode = #tpu.pipeline_mode<synchronous>, transform_indices = @transform_2, window_bounds = array<i64: 16, 32>}, {pipeline_mode = #tpu.pipeline_mode<synchronous>, transform_indices = @transform_3, window_bounds = array<i64: 16, 1>}, {transform_indices = @transform_4, window_bounds = array<i64: 16, 256>}]} {
    %c0 = arith.constant 0 : index
    %c0_0 = arith.constant 0 : index
    %0 = vector.load %arg1[%c0, %c0_0] : memref<16x256xf32, #tpu.memory_space<vmem>>, vector<16x256xf32>
    %c0_1 = arith.constant 0 : index
    %c0_2 = arith.constant 0 : index
    %1 = vector.load %arg2[%c0_1, %c0_2] : memref<16x256xf32, #tpu.memory_space<vmem>>, vector<16x256xf32>
    %2 = tpu.concatenate %0, %1 in 0 : vector<16x256xf32>, vector<16x256xf32> -> vector<32x256xf32>
    %c0_3 = arith.constant 0 : index
    %c0_4 = arith.constant 0 : index
    %3 = vector.load %arg3[%c0_3, %c0_4] : memref<16x32xf32, #tpu.memory_space<vmem>>, vector<16x32xf32>
    %cst = arith.constant dense<0.000000e+00> : vector<16x256xf32>
    %4 = tpu.matmul %3, %2, %cst {dimension_numbers = #tpu.dot_dimension_numbers<[1], [0], [0], [1], [0, 0, 1, 1], [], []>} : vector<16x32xf32>, vector<32x256xf32>, vector<16x256xf32> -> vector<16x256xf32>
    %c0_5 = arith.constant 0 : index
    %c0_6 = arith.constant 0 : index
    %5 = vector.load %arg4[%c0_5, %c0_6] : memref<16x1xf32, #tpu.memory_space<vmem>>, vector<16x1xf32>
    %6 = vector.broadcast %5 : vector<16x1xf32> to vector<16x256xf32>
    %7 = arith.addf %4, %6 : vector<16x256xf32>
    %cst_7 = arith.constant 0.000000e+00 : f32
    %8 = vector.broadcast %cst_7 : f32 to vector<16x256xf32>
    %9 = arith.maximumf %7, %8 : vector<16x256xf32>
    %c0_8 = arith.constant 0 : index
    %c0_9 = arith.constant 0 : index
    %10 = vector.load %arg5[%c0_8, %c0_9] : memref<16x256xf32, #tpu.memory_space<vmem>>, vector<16x256xf32>
    tpu.vector_store %arg5[%c0_8, %c0_9], %9 {strides = array<i32>} : memref<16x256xf32, #tpu.memory_space<vmem>>, vector<16x256xf32>,
    return
  }
  func.func @transform_0(%arg0: i32) -> (i32, i32) {
    %c0_i32 = arith.constant 0 : i32
    %c0_i32_0 = arith.constant 0 : i32
    return %arg0, %c0_i32 : i32, i32
  }
  func.func @transform_1(%arg0: i32) -> (i32, i32) {
    %c0_i32 = arith.constant 0 : i32
    %c0_i32_0 = arith.constant 0 : i32
    return %arg0, %c0_i32 : i32, i32
  }
  func.func @transform_2(%arg0: i32) -> (i32, i32) {
    %c0_i32 = arith.constant 0 : i32
    %c0_i32_0 = arith.constant 0 : i32
    %c0_i32_1 = arith.constant 0 : i32
    return %c0_i32, %c0_i32_0 : i32, i32
  }
  func.func @transform_3(%arg0: i32) -> (i32, i32) {
    %c0_i32 = arith.constant 0 : i32
    %c0_i32_0 = arith.constant 0 : i32
    %c0_i32_1 = arith.constant 0 : i32
    return %c0_i32, %c0_i32_0 : i32, i32
  }
  func.func @transform_4(%arg0: i32) -> (i32, i32) {
    %c0_i32 = arith.constant 0 : i32
    %c0_i32_0 = arith.constant 0 : i32
    return %arg0, %c0_i32 : i32, i32
  }
}

</mosaic_0001>

<bundles_post_ra>
// kernel: tpu_custom_call.1
= control target key start
LH: loop header
LB: loop body
LE: loop exit
PB: predicated region body
PF: predicated region fallthrough
CT: control target
= control target key end

     0   :  { %9 = vsyncpa [#allocation3], 0  ;;  %s976_s0 = inlined_call_operand.hbm [shape: f32[32,256], index: 0, kind: input, shape index: {}]   ;;  %s977_s1 = inlined_call_operand.hbm [shape: f32[32,256], index: 1, kind: input, shape index: {}]   ;;  %s978_s2 = inlined_call_operand.vmem [shape: f32[16,32], index: 2, kind: input, shape index: {}]   ;;  %s979_s3 = inlined_call_operand.vmem [shape: f32[16,1], index: 3, kind: input, shape index: {}]   ;;  %s980_s4 = inlined_call_operand.hbm [shape: f32[32,256], index: 4, kind: output, shape index: {}]  }
   0x1   :  { %11 = vsyncpa [#allocation3 + $0x1], 0 }
   0x2   :  { %12 = vsyncpa [#allocation6], 0 }
   0x3   :  { %14 = vsyncpa [#allocation6 + $0x1], 0 }
   0x4   :  { %15 = vsyncpa [#allocation4], 0 }
   0x5   :  { %17 = vsyncpa [#allocation4 + $0x1], 0  ;;  %s741_s15 = smov 0   ;;  %s743_s16 = smov 0  }
   0x6   :  { %s745_s17 = smov 0   ;;  %s747_s18 = smov 0  }
   0x7 LB: > { %s762_s19 = sadd.s32 4294967295, %s705_s18   ;;  %s486_s20 = sadd.s32 4294967294, %s705_s18   ;;  %s705_s18 = sphi %s747_s18, %s996_s18   ;;  %s701_s17 = sphi %s745_s17, %s995_s17   ;;  %s697_s16 = sphi %s743_s16, %s994_s16   ;;  %s693_s15 = sphi %s741_s15, %s993_s15  }
   0x8   : > { %s766_s21 = sadd.s32 1, %s705_s18   ;;  %s30_s22 = sadd.s32 1, %s701_s17 }
   0x9   : > { %s27_s23 = ssub.s32 %s705_s18, %s766_s21  ;;  %p37_p0 = scmp.ne.s32.totalorder %s701_s17, %s697_s16 }
   0xa   : > { %p28_p1 = scmp.eq.s32.totalorder %s27_s23, 0  ;;  %p38_p2 = scmp.eq.s32.totalorder %s705_s18, 0 }
   0xb   : > { %p43_p3 = scmp.ne.s32.totalorder %s697_s16, %s693_s15  ;;  %p44_p4 = scmp.eq.s32.totalorder %s762_s19, 0 }
   0xc   : > { %s778_s24 = scalar_select %p28_p1, %s701_s17, %s30_s22  }
   0xd   : > { %p780_p5 = por %p38_p2, %p37_p0  ;;  %p784_p6 = por %p44_p4, %p43_p3 }
   0xe   : > { %p135_p7 = scmp.eq.s32.totalorder %s762_s19, 1  ;;  %p141_p8 = scmp.eq.s32.totalorder %s486_s20, 1 }
   0xf   : > { %s984_s26 = scalar_select %p784_p6, 1, 0 }
  0x10   : > { %p540_p10 = scmp.lt.s32.totalorder %s705_s18, 2  ;;  %p791_p11 = por %p135_p7, %p37_p0 }
  0x11   : > { %p795_p12 = por %p141_p8, %p43_p3  ;;  %s800_s29 = sand.u32 1, %s701_s17  }
  0x12   : > { %s985_s27 = scalar_select %p791_p11, 1, 0 }
  0x13   : > { %s986_s28 = scalar_select %p795_p12, 1, 0 }
  0x14   : > { %s510_s30 = sshll.u32 %s705_s18, 9  ;;  %s489_s5 = sshll.u32 %s800_s29, 5 }
  0x15   : > { %s809_s8 = scalar_lea.hbm %s976_s0, %s510_s30  ;;  %s171_s9 = scalar_lea.vmem [#allocation2], %s489_s5 }
  0x16   : > { %s179_s10 = sshll.u32 %s171_s9, 4  ;;  %p815_p13 = pnand %p540_p10, %p780_p5  ;;  %s819_s10 = int_to_ptr.vmem [resolvable:$true] %s179_s10 }
  0x17   : > { %s168_s12 = scalar_lea.sflag [#allocation3], %s800_s29  ;;  %s581_s13 = scalar_lea.hbm %s809_s8, 512 }
  0x18   : > { %p582_p0 = scmp.ne.s32.totalorder %s809_s8, %s581_s13  ;;  %p583_p1 = pneg %p815_p13 }
  0x19   : > { %s586_s22 = scalar_lea.hbm %s976_s0, 1024  ;;  %p587_p4 = scmp.lt.s32.totalorder %s809_s8, %s976_s0 }
  0x1a   : > { %p584_p2 = pnand %p583_p1, %p582_p0  ;;  %p588_p5 = scmp.lt.s32.totalorder %s586_s22, %s581_s13 }
  0x1c   : > { %p585_p3 = pneg %p584_p2  ;;  %p589_p7 = por %p588_p5, %p587_p4 }
  0x1e   : > { %p590_p8 = pnand %p589_p7, %p585_p3 }
  0x20   : > { %593 = shalt.err (!%p590_p8)
}
  0x21   : > { %s594_s6 = scalar_lea.vmem %s819_s10, 512  ;;  %s707_s7 = smov [#allocation2]  }
  0x22   : > { %p595_p10 = scmp.ne.s32.totalorder %s819_s10, %s594_s6  ;;  %s599_s9 = sshll.u32 %s707_s7, 4  ;;  %s600_s9 = int_to_ptr.vmem [resolvable:$false] %s599_s9 }
  0x23   : > { %s601_s14 = scalar_lea.vmem %s600_s9, 1024  ;;  %p602_p9 = scmp.lt.s32.totalorder %s819_s10, %s600_s9 }
  0x24   : > { %p597_p0 = pnand %p595_p10, %p583_p1  ;;  %p603_p12 = scmp.lt.s32.totalorder %s601_s14, %s594_s6 }
  0x26   : > { %p598_p2 = pneg %p597_p0  ;;  %p604_p11 = por %p603_p12, %p602_p9 }
  0x28   : > { %p605_p4 = pnand %p604_p11, %p598_p2 }
  0x2a   : > { %608 = shalt.err (!%p605_p4)
}
  0x2b   : > { %s708_s13 = smov 256   ;;  %s709_s20 = smov 16  }
  0x2c   : > { %532 = dma.hbm_to_vmem [thread:$0]  (!%p815_p13), %s809_s8, 512, %s819_s10, %s168_s12, %s708_s13, %s708_s13, %s709_s20  }
  0x2d   : > { %p497_p9 = scmp.ge.s32.totalorder %s705_s18, 1  ;;  %p209_p11 = scmp.lt.s32.totalorder %s705_s18, 3 }
  0x2e   : > { %s862_s6 = scalar_lea.hbm %s977_s1, %s510_s30  ;;  %s193_s7 = scalar_lea.vmem [#allocation5], %s489_s5 }
  0x2f   : > { %p853_p12 = pnand %p497_p9, %p209_p11  ;;  %s201_s9 = sshll.u32 %s193_s7, 4  ;;  %s866_s9 = int_to_ptr.vmem [resolvable:$true] %s201_s9 }
  0x30   : > { %s190_s8 = scalar_lea.sflag [#allocation6], %s800_s29  ;;  %s609_s10 = scalar_lea.hbm %s862_s6, 512 }
  0x31   : > { %p610_p3 = scmp.ne.s32.totalorder %s862_s6, %s609_s10  ;;  %s614_s30 = scalar_lea.hbm %s977_s1, 1024 }
  0x32   : > { %p615_p8 = scmp.lt.s32.totalorder %s862_s6, %s977_s1  ;;  %p616_p10 = scmp.lt.s32.totalorder %s614_s30, %s609_s10 }
  0x33   : > { %p612_p5 = pnand %p610_p3, %p583_p1 }
  0x34   : > { %p617_p0 = por %p616_p10, %p615_p8 }
  0x35   : > { %p613_p7 = pneg %p612_p5 }
  0x37   : > { %p618_p2 = pnand %p617_p0, %p613_p7 }
  0x39   : > { %621 = shalt.err (!%p618_p2)
}
  0x3a   : > { %s622_s29 = scalar_lea.vmem %s866_s9, 512  ;;  %s710_s5 = smov [#allocation5]  }
  0x3b   : > { %p623_p4 = scmp.ne.s32.totalorder %s866_s9, %s622_s29  ;;  %s627_s7 = sshll.u32 %s710_s5, 4  ;;  %s628_s7 = int_to_ptr.vmem [resolvable:$false] %s627_s7 }
  0x3c   : > { %s629_s12 = scalar_lea.vmem %s628_s7, 1024  ;;  %p630_p3 = scmp.lt.s32.totalorder %s866_s9, %s628_s7 }
  0x3d   : > { %p625_p9 = pnand %p623_p4, %p583_p1  ;;  %p631_p5 = scmp.lt.s32.totalorder %s629_s12, %s622_s29 }
  0x3f   : > { %p626_p11 = pneg %p625_p9  ;;  %p632_p6 = por %p631_p5, %p630_p3 }
  0x41   : > { %p633_p8 = pnand %p632_p6, %p626_p11 }
  0x43   : > { %636 = shalt.err (!%p633_p8)
}
  0x44   : > { %535 = dma.hbm_to_vmem [thread:$0]  (!%p815_p13), %s862_s6, 512, %s866_s9, %s190_s8, %s708_s13, %s708_s13, %s709_s20  }
  0x45   : > { %213 = sbr.rel (%p853_p12) target bundleno = 301 (0x12d), region = 36  ;;  %s897_s10 = sand.u32 (!%p853_p12), 1, %s697_s16  }
  0x46   : > { %s900_s14 = sshll.u32 (!%p853_p12), %s897_s10, 5  ;;  %s216_s30 = scalar_lea.sflag (!%p853_p12), [#allocation3], %s897_s10 }
  0x47   : > { %s219_s11 = scalar_lea.vmem (!%p853_p12), [#allocation2], %s900_s14  ;;  %p989_p6 = scmp.ne.s32.totalorder (!%p853_p12), %s984_s26, 0 }
  0x4a   : > { %680 = dma.done.wait (%p989_p6), %s216_s30, 512  }
  0x4b   : > { %682 = vsyncadd (%p989_p6), %s216_s30, 4294966784  ;;  %s225_s13 = scalar_lea.sflag [#allocation6], %s897_s10  ;;  %s228_s20 = scalar_lea.vmem [#allocation5], %s900_s14 }
  0x4c   : > { %684 = dma.done.wait (%p989_p6), %s225_s13, 512  }
  0x4d   : > { %686 = vsyncadd (%p989_p6), %s225_s13, 4294966784  ;;  %v711_v0 = vmov 0.0   ;;  %v712_v1 = vmov 0   ;;  %v268_v2 = vld [vmem:[%s228_s20 + $0x18] sm:$0xff]  ;;  %v267_v3 = vld [vmem:[%s228_s20 + $0x10] sm:$0xff]  ;;  %vm283_vm0 = vcmask 261120  }
  0x4e   : > { %354 = vmatprep.mubr.f32.mxu0 %v711_v0  ;;  %360 = vmatprep.mubr.f32.mxu1 %v711_v0  ;;  %v266_v4 = vld [vmem:[%s228_s20 + $0x8] sm:$0xff]  ;;  %v265_v5 = vld [vmem:[%s228_s20] sm:$0xff]  ;;  %v264_v6 = vld [vmem:[%s219_s11 + $0x18] sm:$0xff]  ;;  %s257_s5 = scalar_lea.vmem [#allocation7], %s900_s14  ;;  %s514_s12 = sshll.u32 %s762_s19, 9 }
  0x4f   : > { %580 = vset.pattern.permute.xlu0 %v712_v1  ;;  %314 = vmatprep.subr.mxu0 %v268_v2  ;;  %v263_v7 = vld [vmem:[%s219_s11 + $0x10] sm:$0xff]  ;;  %v262_v8 = vld [vmem:[%s219_s11 + $0x8] sm:$0xff]  ;;  %v261_v9 = vld [vmem:[%s219_s11] sm:$0xff]  ;;  %s390_s7 = sshll.u32 %s257_s5, 4  ;;  %s933_s14 = scalar_lea.hbm %s980_s4, %s514_s12  ;;  %s928_s7 = int_to_ptr.vmem [resolvable:$true] %s390_s7 }
  0x50   : > { %515 = vmatprep.subr.mxu1 %v268_v2  ;;  %315 = vmatpush1.msra.mxu0 %v267_v3  ;;  %v269_v10 = vld [vmem:[%s978_s2] sm:$0xff]  ;;  %v270_v11 = vld [vmem:[%s978_s2 + $0x8] sm:$0xff]  ;;  %s376_s19 = scalar_lea.sflag [#allocation4], %s897_s10  ;;  %s637_s13 = scalar_lea.vmem %s928_s7, 512 }
  0x51   : > { %519 = vmatpush1.msra.mxu1 %v267_v3  ;;  %316 = vmatprep.subr.mxu0 %v266_v4  ;;  %v271_v12 = vld [vmem:[%s979_s3] sm:$0xff]  ;;  %v272_v13 = vld [vmem:[%s979_s3 + $0x8] sm:$0xff]  ;;  %p638_p13 = scmp.ne.s32.totalorder %s928_s7, %s637_s13  ;;  %p990_p1 = scmp.ne.s32.totalorder %s985_s27, 0 }
  0x52   : > { %516 = vmatprep.subr.mxu1 %v266_v4  ;;  %317 = vmatpush1.msra.mxu0 %v265_v5  ;;  %s713_s20 = smov [#allocation7]  }
  0x53   : > { %520 = vmatpush1.msra.mxu1 %v265_v5  ;;  %318 = vmatprep.subr.mxu0 %v264_v6  ;;  %p639_p12 = pnand %p638_p13, %p990_p1  ;;  %s641_s26 = sshll.u32 %s713_s20, 4  ;;  %s642_s26 = int_to_ptr.vmem [resolvable:$false] %s641_s26 }
  0x54   : > { %517 = vmatprep.subr.mxu1 %v264_v6  ;;  %319 = vmatpush1.msra.mxu0 %v263_v7  ;;  %s643_s22 = scalar_lea.vmem %s642_s26, 1024  ;;  %p644_p10 = scmp.lt.s32.totalorder %s928_s7, %s642_s26 }
  0x55   : > { %521 = vmatpush1.msra.mxu1 %v263_v7  ;;  %320 = vmatprep.subr.mxu0 %v262_v8  ;;  %p640_p7 = pneg %p639_p12  ;;  %p645_p0 = scmp.lt.s32.totalorder %s643_s22, %s637_s13 }
  0x56   : > { %518 = vmatprep.subr.mxu1 %v262_v8  ;;  %321 = vmatpush1.msra.mxu0 %v261_v9 }
  0x57   : > { %522 = vmatpush1.msra.mxu1 %v261_v9  ;;  %501 = vmatmul.mubr.msk.f32.vlgmr.msra.gmra.mxu0 %vm283_vm0, %v269_v10  ;;  %p646_p2 = por %p645_p0, %p644_p10 }
  0x58   : > { %502 = vmatmul.mubr.msk.f32.vlgmr.msra.gmra.mxu1 %vm283_vm0, %v270_v11  ;;  %275 = vperm.xlu0 %580, %v271_v12  }
  0x59   : > { %p647_p4 = pnand %p646_p2, %p640_p7 }
  0x5c   : > { %280 = vperm.xlu0 %580, %v272_v13  }
  0xd3   : > { %v276_v14 = vpop.permute.xlu0 %275 }
  0xd7   : > { %v281_v15 = vpop.permute.xlu0 %280 }
 0x117   : > { %v356_v16 = vpop.f32.mrf.mxu0 }
 0x118   : > { %v362_v17 = vpop.f32.mrf.mxu1  ;;  %v357_v18 = vadd.f32 %v356_v16, %v276_v14 }
 0x119   : > { %v363_v19 = vadd.f32 %v362_v17, %v281_v15  ;;  %v358_v20 = vpop.f32.mrf.mxu0 }
 0x11a   : > { %v364_v21 = vpop.f32.mrf.mxu1  ;;  %v367_v22 = vmax.f32 %v357_v18, 0.0  ;;  %v359_v24 = vadd.f32 %v358_v20, %v276_v14 }
 0x11b   : > { %v369_v23 = vmax.f32 %v363_v19, 0.0  ;;  %v365_v25 = vadd.f32 %v364_v21, %v281_v15 }
 0x11c   : > { %371 = vst [vmem:[%s257_s5] sm:$0xff] %v367_v22  ;;  %v368_v26 = vmax.f32 %v359_v24, 0.0 }
 0x11d   : > { %373 = vst [vmem:[%s257_s5 + $0x10] sm:$0xff] %v369_v23  ;;  %v370_v27 = vmax.f32 %v365_v25, 0.0 }
 0x11e   : > { %372 = vst [vmem:[%s257_s5 + $0x8] sm:$0xff] %v368_v26 }
 0x11f   : > { %374 = vst [vmem:[%s257_s5 + $0x18] sm:$0xff] %v370_v27 }
 0x120   : > { %650 = shalt.err (!%p647_p4)
}
 0x121   : > { %s651_s6 = scalar_lea.hbm %s933_s14, 512  ;;  %s655_s23 = scalar_lea.hbm %s980_s4, 1024 }
 0x122   : > { %p652_p9 = scmp.ne.s32.totalorder %s933_s14, %s651_s6  ;;  %p656_p5 = scmp.lt.s32.totalorder %s933_s14, %s980_s4 }
 0x123   : > { %p657_p8 = scmp.lt.s32.totalorder %s655_s23, %s651_s6 }
 0x124   : > { %p653_p11 = pnand %p652_p9, %p990_p1 }
 0x125   : > { %p658_p6 = por %p657_p8, %p656_p5 }
 0x126   : > { %p654_p3 = pneg %p653_p11 }
 0x128   : > { %p659_p13 = pnand %p658_p6, %p654_p3 }
 0x12a   : > { %662 = shalt.err (!%p659_p13)
}
 0x12b   : > { %s714_s5 = smov 256   ;;  %s715_s12 = smov 16  }
 0x12c   : > { %527 = dma.vmem_to_hbm [thread:$0]  (%p990_p1), %s928_s7, 512, %s933_s14, %s376_s19, %s714_s5, %s714_s5, %s715_s12  }
 0x12d PF: > { %s405_s30 = sand.u32 1, %s693_s15   ;;  %p991_p12 = scmp.ne.s32.totalorder %s986_s28, 0 }
 0x12e   : > { %p992_p7 = scmp.ge.s32.totalorder %s705_s18, 2  ;;  %s406_s11 = scalar_lea.sflag [#allocation4], %s405_s30 }
 0x130   : > { %p537_p10 = pnand %p992_p7, %p991_p12 }
 0x132   : > { %p538_p0 = pneg %p537_p10 }
 0x134   : > { %688 = dma.done.wait (%p538_p0), %s406_s11, 512  }
 0x135   : > { %690 = vsyncadd (%p538_p0), %s406_s11, 4294966784  ;;  %p20_p2 = scmp.ge.s32.totalorder %s766_s21, 4   ;;  %s993_s15 = smov %s697_s16 }
 0x136   : > { %s994_s16 = smov %s701_s17  ;;  %s995_s17 = smov %s778_s24 }
 0x137   : > { %s996_s18 = smov %s766_s21  ;;  %22 = sbr.rel (!%p20_p2) target bundleno = 7 (0x7), region = 94 }
 0x13c   :  { %411 = vsyncpa [#allocation3], 1 }
 0x13d   :  { %413 = vsyncpa [#allocation3 + $0x1], 1 }
 0x13e   :  { %414 = vsyncpa [#allocation6], 1 }
 0x13f   :  { %416 = vsyncpa [#allocation6 + $0x1], 1 }
 0x140   :  { %417 = vsyncpa [#allocation4], 1 }
 0x141   :  { %419 = vsyncpa [#allocation4 + $0x1], 1 }

</bundles_post_ra>
